<compile_context>
chip_gen: v5e
topology: v5e:2x2
jax: 0.10.0
libtpu: 0.0.40
codegen_flags: <defaults>
</compile_context>

<pallas_src>
import functools

import jax
import jax.numpy as jnp
from jax.experimental import pallas as pl
from jax.experimental.pallas import tpu as pltpu

LANE = 128
SUBLANE_PACK_BF16 = 16  # bf16 packs 2 rows per sublane -> keep Cin a multiple of 16


def _round_up(x, m):
    return (x + m - 1) // m * m


def conv1x1_kernel(x_ref, w_ref, b_ref, o_ref):
    # Single-block GEMV on the MXU (bf16 inputs, f32 accumulate),
    # bias add on the otherwise-idle VPU.
    acc = jnp.dot(x_ref[...], w_ref[...], preferred_element_type=jnp.float32)
    o_ref[...] = (acc + b_ref[...]).astype(o_ref.dtype)


def prepare_conv1x1_params(weight_oi, bias_o, cin_pad, cout_pad):
    """One-time parameter prep (hoisted out of the per-call path).

    weight_oi: [Cout, Cin]  (PyTorch conv weight squeezed over the 1x1 kernel)
    bias_o   : [Cout]
    returns  : (w_io  [cin_pad, cout_pad] bf16,  b2  [1, cout_pad] f32)
    """
    cout, cin = weight_oi.shape
    w_io = jnp.transpose(weight_oi, (1, 0))                                # [Cin, Cout]
    w_io = jnp.pad(w_io, ((0, cin_pad - cin), (0, cout_pad - cout)))
    b2 = jnp.pad(bias_o, (0, cout_pad - cout)).reshape(1, cout_pad)
    return w_io.astype(jnp.bfloat16), b2.astype(jnp.float32)


def conv2d_1x1(x_nchw, w_io_p, b2_p, cout):
    """1x1 stride-1 Conv2d via a grid-less Pallas matmul kernel.

    x_nchw : [N, Cin, H, W]  (f32)
    w_io_p : [Cin_pad, Cout_pad]  bf16  (from prepare_conv1x1_params)
    b2_p   : [1, Cout_pad]        f32
    returns: [N, Cout, H, W]      f32
    """
    n, cin, h, w = x_nchw.shape
    cin_p, cout_p = w_io_p.shape
    p = n * h * w

    # NCHW -> (P, Cin), pad Cin, cast to bf16 for the MXU. (Tiny: 50 floats.)
    x_pc = jnp.transpose(x_nchw, (0, 2, 3, 1)).reshape(p, cin)
    x_pc = jnp.pad(x_pc, ((0, 0), (0, cin_p - cin))).astype(jnp.bfloat16)

    cost = pl.CostEstimate(
        flops=2 * p * cin_p * cout_p,
        transcendentals=0,
        bytes_accessed=(p * cin_p * 2            # x  (bf16)
                        + cin_p * cout_p * 2     # W  (bf16) -- dominant
                        + cout_p * 4             # bias (f32)
                        + p * cout_p * 4),       # out  (f32)
    )

    out_pc = pl.pallas_call(
        conv1x1_kernel,
        out_shape=jax.ShapeDtypeStruct((p, cout_p), jnp.float32),
        in_specs=[
            pl.BlockSpec(memory_space=pltpu.MemorySpace.VMEM),
            pl.BlockSpec(memory_space=pltpu.MemorySpace.VMEM),
            pl.BlockSpec(memory_space=pltpu.MemorySpace.VMEM),
        ],
        out_specs=pl.BlockSpec(memory_space=pltpu.MemorySpace.VMEM),
        cost_estimate=cost,
    )(x_pc, w_io_p, b2_p)

    # Slice back to the real Cout, (P, Cout) -> NCHW.
    out_pc = out_pc[:, :cout]
    return jnp.transpose(out_pc.reshape(n, h, w, cout), (0, 3, 1, 2))


if __name__ == "__main__":
    key = jax.random.PRNGKey(0)
    k_x, k_w, k_b = jax.random.split(key, 3)

    N, CIN, COUT, H, W = 1, 50, 1200, 1, 1
    CIN_P = _round_up(CIN, SUBLANE_PACK_BF16)   # 50 -> 64
    COUT_P = _round_up(COUT, LANE)              # 1200 -> 1280

    x = jax.random.normal(k_x, (N, CIN, H, W), dtype=jnp.float32)
    # Deterministic synthetic params (shapes match Conv2d(50, 1200, 1)).
    weight = jax.random.normal(k_w, (COUT, CIN), dtype=jnp.float32) * 0.02
    bias = jax.random.normal(k_b, (COUT,), dtype=jnp.float32) * 0.02

    # Parameter prep happens ONCE (transpose + pad + bf16 cast hoisted here).
    w_p, b_p = prepare_conv1x1_params(weight, bias, CIN_P, COUT_P)

    conv_fn = jax.jit(functools.partial(conv2d_1x1, cout=COUT))
    y = conv_fn(x, w_p, b_p)
    y = jax.block_until_ready(y)

    # Reference check against plain f32 JAX (kernel uses bf16 operands with
    # f32 accumulation, so allow bf16-level tolerance).
    ref = (jnp.einsum("nchw,oc->nohw", x, weight)
           + bias.reshape(1, COUT, 1, 1))
    assert y.shape == (N, COUT, H, W), y.shape
    max_err = float(jnp.max(jnp.abs(y - ref)))
    assert jnp.allclose(y, ref, atol=2e-2, rtol=2e-2), max_err

    print("KERNEL_OK")
</pallas_src>

<mosaic_0001>
module attributes {stable_mosaic.version = 11 : i64} {
  func.func @conv1x1_kernel(%arg0: memref<1x64xbf16, #tpu.memory_space<vmem>>, %arg1: memref<64x1280xbf16, #tpu.memory_space<vmem>>, %arg2: memref<1x1280xf32, #tpu.memory_space<vmem>>, %arg3: memref<1x1280xf32, #tpu.memory_space<vmem>>) attributes {dimension_semantics = [], scalar_prefetch = 0 : i64, scratch_operands = 0 : i64, tpu.core_type = #tpu.core_type<tc>} {
    %c0 = arith.constant 0 : index
    %c0_0 = arith.constant 0 : index
    %0 = vector.load %arg0[%c0, %c0_0] : memref<1x64xbf16, #tpu.memory_space<vmem>>, vector<1x64xbf16>
    %c0_1 = arith.constant 0 : index
    %c0_2 = arith.constant 0 : index
    %1 = vector.load %arg1[%c0_1, %c0_2] : memref<64x1280xbf16, #tpu.memory_space<vmem>>, vector<64x1280xbf16>
    %cst = arith.constant dense<0.000000e+00> : vector<1x1280xf32>
    %2 = tpu.matmul %0, %1, %cst {dimension_numbers = #tpu.dot_dimension_numbers<[1], [0], [0], [1], [0, 0, 1, 1], [], []>} : vector<1x64xbf16>, vector<64x1280xbf16>, vector<1x1280xf32> -> vector<1x1280xf32>
    %c0_3 = arith.constant 0 : index
    %c0_4 = arith.constant 0 : index
    %3 = vector.load %arg2[%c0_3, %c0_4] : memref<1x1280xf32, #tpu.memory_space<vmem>>, vector<1x1280xf32>
    %4 = arith.addf %2, %3 : vector<1x1280xf32>
    %c0_5 = arith.constant 0 : index
    %c0_6 = arith.constant 0 : index
    %5 = vector.load %arg3[%c0_5, %c0_6] : memref<1x1280xf32, #tpu.memory_space<vmem>>, vector<1x1280xf32>
    tpu.vector_store %arg3[%c0_5, %c0_6], %4 {strides = array<i32>} : memref<1x1280xf32, #tpu.memory_space<vmem>>, vector<1x1280xf32>,
    return
  }
}

</mosaic_0001>

<bundles_post_ra>
// kernel: conv2d_1x1.1
= control target key start
LH: loop header
LB: loop body
LE: loop exit
PB: predicated region body
PF: predicated region fallthrough
CT: control target
= control target key end

     0   :  { %8 = vsyncpa [#allocation3], 0  ;;  %s820_s0 = inlined_call_operand.vmem [shape: bf16[1,64], index: 0, kind: input, shape index: {}]   ;;  %s821_s1 = inlined_call_operand.hbm [shape: bf16[64,1280], index: 1, kind: input, shape index: {}]   ;;  %s822_s2 = inlined_call_operand.hbm [shape: f32[1,1280], index: 2, kind: input, shape index: {}]   ;;  %s823_s3 = inlined_call_operand.vmem [shape: f32[1,1280], index: 3, kind: output, shape index: {}]  }
   0x1   :  { %s16_s14 = sshll.u32 %s821_s1, 4  ;;  %s17_s14 = int_to_ptr.hbm [resolvable:$true] %s16_s14 }
   0x2   :  { %9 = vsyncpa [#allocation5], 0  ;;  %s757_s15 = smov [#allocation2]   ;;  %s30_s19 = sshll.u32 %s822_s2, 4  ;;  %s31_s19 = int_to_ptr.hbm [resolvable:$true] %s30_s19 }
   0x3   :  { %s18_s16 = sshll.u32 %s757_s15, 4  ;;  %s758_s20 = smov 640   ;;  %s19_s16 = int_to_ptr.vmem [resolvable:$true] %s18_s16 }
   0x4   :  { %s759_s21 = smov 40   ;;  %s760_s22 = smov [#allocation4]  }
   0x5   :  { %24 = dma.hbm_to_vmem [thread:$0]  %s17_s14, 5120, %s19_s16, [#allocation3], %s758_s20, %s758_s20, %s759_s21  }
   0x6   :  { %s32_s23 = sshll.u32 %s760_s22, 4  ;;  %s33_s23 = int_to_ptr.vmem [resolvable:$true] %s32_s23 }
   0x7   :  { %35 = dma.hbm_to_vmem [thread:$0]  %s31_s19, 160, %s33_s23, [#allocation5]  }
   0x8   :  { %753 = dma.done.wait [#allocation3], 5120  }
   0x9   :  { %754 = vsyncadd [#allocation3], 4294962176 }
   0xa   :  { %755 = dma.done.wait [#allocation5], 160  }
   0xb   :  { %756 = vsyncadd [#allocation5], 4294967136  ;;  %v613_v0 = vld [vmem:[#allocation2 + $0xf0] sm:$0xf]  ;;  %v696_v1 = vld [vmem:[#allocation2 + $0x114] sm:$0xf0] }
   0xc   :  { %v691_v2 = vld [vmem:[#allocation2 + $0xf4] sm:$0xf]  ;;  %v614_v3 = vor.u32 %v696_v1, %v613_v0  ;;  %v615_v4 = vld [vmem:[#allocation2 + $0x118] sm:$0xf0]  ;;  %v621_v5 = vld [vmem:[#allocation2 + $0xf8] sm:$0xf] }
   0xd   :  { %v697_v6 = vld [vmem:[#allocation2 + $0x11c] sm:$0xf0]  ;;  %v618_v7 = vor.u32 %v691_v2, %v615_v4  ;;  %v692_v9 = vld [vmem:[#allocation2 + $0xfc] sm:$0xf]  ;;  %v623_v10 = vld [vmem:[#allocation2 + $0x120] sm:$0xf0] }
   0xe   :  { %v622_v8 = vor.u32 %v697_v6, %v621_v5  ;;  %v573_v11 = vld [vmem:[#allocation2 + $0xa0] sm:$0xf]  ;;  %318 = vmatpush.bf16.msra.mxu0 %v614_v3  ;;  %v626_v12 = vor.u32 %v692_v9, %v623_v10  ;;  %v686_v13 = vld [vmem:[#allocation2 + $0xc4] sm:$0xf0]  ;;  %v681_v14 = vld [vmem:[#allocation2 + $0xa4] sm:$0xf] }
   0xf   :  { %v575_v15 = vld [vmem:[#allocation2 + $0xc8] sm:$0xf0]  ;;  %331 = vmatpush.bf16.msra.mxu1 %v618_v7  ;;  %v574_v16 = vor.u32 %v686_v13, %v573_v11  ;;  %v581_v18 = vld [vmem:[#allocation2 + $0xa8] sm:$0xf]  ;;  %v687_v19 = vld [vmem:[#allocation2 + $0xcc] sm:$0xf0] }
  0x10   :  { %344 = vmatpush.bf16.msra.mxu2 %v622_v8  ;;  %v578_v17 = vor.u32 %v681_v14, %v575_v15  ;;  %v682_v20 = vld [vmem:[#allocation2 + $0xac] sm:$0xf]  ;;  %357 = vmatpush.bf16.msra.mxu3 %v626_v12  ;;  %v582_v21 = vor.u32 %v687_v19, %v581_v18  ;;  %v583_v22 = vld [vmem:[#allocation2 + $0xd0] sm:$0xf0]  ;;  %v533_v23 = vld [vmem:[#allocation2 + $0x50] sm:$0xf] }
  0x11   :  { %v676_v24 = vld [vmem:[#allocation2 + $0x74] sm:$0xf0]  ;;  %v586_v25 = vor.u32 %v682_v20, %v583_v22  ;;  %v671_v26 = vld [vmem:[#allocation2 + $0x54] sm:$0xf]  ;;  %v535_v27 = vld [vmem:[#allocation2 + $0x78] sm:$0xf0] }
  0x12   :  { %v541_v28 = vld [vmem:[#allocation2 + $0x58] sm:$0xf]  ;;  %319 = vmatpush.bf16.msra.mxu0 %v574_v16  ;;  %v534_v29 = vor.u32 %v676_v24, %v533_v23  ;;  %v677_v30 = vld [vmem:[#allocation2 + $0x7c] sm:$0xf0]  ;;  %v672_v31 = vld [vmem:[#allocation2 + $0x5c] sm:$0xf]  ;;  %v538_v33 = vor.u32 %v671_v26, %v535_v27 }
  0x13   :  { %v543_v32 = vld [vmem:[#allocation2 + $0x80] sm:$0xf0]  ;;  %332 = vmatpush.bf16.msra.mxu1 %v578_v17  ;;  %v542_v34 = vor.u32 %v677_v30, %v541_v28  ;;  %v493_v35 = vld [vmem:[#allocation2] sm:$0xf]  ;;  %v666_v36 = vld [vmem:[#allocation2 + $0x24] sm:$0xf0] }
  0x14   :  { %345 = vmatpush.bf16.msra.mxu2 %v582_v21  ;;  %v661_v37 = vld [vmem:[#allocation2 + $0x4] sm:$0xf]  ;;  %358 = vmatpush.bf16.msra.mxu3 %v586_v25  ;;  %v546_v38 = vor.u32 %v672_v31, %v543_v32  ;;  %v495_v39 = vld [vmem:[#allocation2 + $0x28] sm:$0xf0]  ;;  %v501_v40 = vld [vmem:[#allocation2 + $0x8] sm:$0xf]  ;;  %v494_v44 = vor.u32 %v666_v36, %v493_v35 }
  0x15   :  { %v667_v41 = vld [vmem:[#allocation2 + $0x2c] sm:$0xf0]  ;;  %v662_v42 = vld [vmem:[#allocation2 + $0xc] sm:$0xf]  ;;  %v503_v43 = vld [vmem:[#allocation2 + $0x30] sm:$0xf0]  ;;  %v498_v48 = vor.u32 %v661_v37, %v495_v39 }
  0x16   :  { %320 = vmatpush.bf16.msra.mxu0 %v534_v29  ;;  %v629_v45 = vld [vmem:[#allocation2 + $0x100] sm:$0xf]  ;;  %v698_v46 = vld [vmem:[#allocation2 + $0x124] sm:$0xf0]  ;;  %v693_v47 = vld [vmem:[#allocation2 + $0x104] sm:$0xf]  ;;  %v502_v49 = vor.u32 %v667_v41, %v501_v40  ;;  %v506_v51 = vor.u32 %v662_v42, %v503_v43 }
  0x17   :  { %333 = vmatpush.bf16.msra.mxu1 %v538_v33  ;;  %vm310_vm0 = vcmask 523264   ;;  %v631_v50 = vld [vmem:[#allocation2 + $0x128] sm:$0xf0]  ;;  %v630_v52 = vor.u32 %v698_v46, %v629_v45  ;;  %v637_v53 = vld [vmem:[#allocation2 + $0x108] sm:$0xf]  ;;  %vm462_vm1 = vcmask 1040384  }
  0x18   :  { %346 = vmatpush.bf16.msra.mxu2 %v542_v34  ;;  %359 = vmatpush.bf16.msra.mxu3 %v546_v38  ;;  %v699_v54 = vld [vmem:[#allocation2 + $0x12c] sm:$0xf0]  ;;  %v694_v55 = vld [vmem:[#allocation2 + $0x10c] sm:$0xf]  ;;  %v634_v56 = vor.u32 %v693_v47, %v631_v50  ;;  %v639_v57 = vld [vmem:[#allocation2 + $0x130] sm:$0xf0] }
  0x19   :  { %v589_v58 = vld [vmem:[#allocation2 + $0xb0] sm:$0xf]  ;;  %v688_v59 = vld [vmem:[#allocation2 + $0xd4] sm:$0xf0]  ;;  %v790_v60 = vld [vmem:[%s820_s0] sm:$0x1]  ;;  %v638_v63 = vor.u32 %v699_v54, %v637_v53  ;;  %v642_v0 = vor.u32 %v694_v55, %v639_v57 }
  0x1a   :  { %321 = vmatpush.bf16.msra.mxu0 %v494_v44  ;;  %v683_v61 = vld [vmem:[#allocation2 + $0xb4] sm:$0xf]  ;;  %v591_v62 = vld [vmem:[#allocation2 + $0xd8] sm:$0xf0]  ;;  %v590_v1 = vor.u32 %v688_v59, %v589_v58  ;;  %v597_v2 = vld [vmem:[#allocation2 + $0xb8] sm:$0xf] }
  0x1b   :  { %334 = vmatpush.bf16.msra.mxu1 %v498_v48  ;;  %v689_v3 = vld [vmem:[#allocation2 + $0xdc] sm:$0xf0]  ;;  %v684_v4 = vld [vmem:[#allocation2 + $0xbc] sm:$0xf]  ;;  %v594_v5 = vor.u32 %v683_v61, %v591_v62  ;;  %v599_v6 = vld [vmem:[#allocation2 + $0xe0] sm:$0xf0] }
  0x1c   :  { %347 = vmatpush.bf16.msra.mxu2 %v502_v49  ;;  %360 = vmatpush.bf16.msra.mxu3 %v506_v51  ;;  %v549_v7 = vld [vmem:[#allocation2 + $0x60] sm:$0xf]  ;;  %v678_v8 = vld [vmem:[#allocation2 + $0x84] sm:$0xf0]  ;;  %v673_v9 = vld [vmem:[#allocation2 + $0x64] sm:$0xf]  ;;  %v598_v11 = vor.u32 %v689_v3, %v597_v2  ;;  %v602_v13 = vor.u32 %v684_v4, %v599_v6 }
  0x1d   :  { %651 = vmatmul.msk.bf16.vlgmr.msra.gmra.mxu0 %vm310_vm0, %v790_v60  ;;  %v551_v10 = vld [vmem:[#allocation2 + $0x88] sm:$0xf0]  ;;  %v557_v12 = vld [vmem:[#allocation2 + $0x68] sm:$0xf]  ;;  %v550_v14 = vor.u32 %v678_v8, %v549_v7  ;;  %v679_v15 = vld [vmem:[#allocation2 + $0x8c] sm:$0xf0] }
  0x1e   :  { %370 = vmatpush.bf16.msrb.mxu0 %v630_v52  ;;  %652 = vmatmul.msk.bf16.vlgmr.msra.gmra.mxu1 %vm310_vm0, %v790_v60  ;;  %v674_v16 = vld [vmem:[#allocation2 + $0x6c] sm:$0xf]  ;;  %v559_v17 = vld [vmem:[#allocation2 + $0x90] sm:$0xf0]  ;;  %v554_v18 = vor.u32 %v673_v9, %v551_v10  ;;  %v509_v19 = vld [vmem:[#allocation2 + $0x10] sm:$0xf]  ;;  %v558_v25 = vor.u32 %v679_v15, %v557_v12 }
  0x1f   :  { %383 = vmatpush.bf16.msrb.mxu1 %v634_v56  ;;  %653 = vmatmul.msk.bf16.vlgmr.msra.gmra.mxu2 %vm310_vm0, %v790_v60  ;;  %v668_v20 = vld [vmem:[#allocation2 + $0x34] sm:$0xf0]  ;;  %v663_v21 = vld [vmem:[#allocation2 + $0x14] sm:$0xf]  ;;  %v511_v22 = vld [vmem:[#allocation2 + $0x38] sm:$0xf0]  ;;  %v562_v28 = vor.u32 %v674_v16, %v559_v17 }
  0x20   :  { %654 = vmatmul.msk.bf16.vlgmr.msra.gmra.mxu3 %vm310_vm0, %v790_v60  ;;  %396 = vmatpush.bf16.msrb.mxu2 %v638_v63  ;;  %v645_v23 = vld [vmem:[#allocation2 + $0x110] sm:$0xf]  ;;  %v700_v24 = vld [vmem:[#allocation2 + $0x134] sm:$0xf0]  ;;  %v695_v26 = vld [vmem:[#allocation2 + $0x114] sm:$0xf]  ;;  %v510_v29 = vor.u32 %v668_v20, %v509_v19  ;;  %v514_v32 = vor.u32 %v663_v21, %v511_v22 }
  0x21   :  { %409 = vmatpush.bf16.msrb.mxu3 %v642_v0  ;;  %v647_v27 = vld [vmem:[#allocation2 + $0x138] sm:$0xf0]  ;;  %v517_v30 = vld [vmem:[#allocation2 + $0x18] sm:$0xf]  ;;  %v669_v31 = vld [vmem:[#allocation2 + $0x3c] sm:$0xf0]  ;;  %v646_v35 = vor.u32 %v700_v24, %v645_v23 }
  0x22   :  { %371 = vmatpush.bf16.msrb.mxu0 %v590_v1  ;;  %v664_v33 = vld [vmem:[#allocation2 + $0x1c] sm:$0xf]  ;;  %v519_v34 = vld [vmem:[#allocation2 + $0x40] sm:$0xf0]  ;;  %v650_v36 = vor.u32 %v695_v26, %v647_v27  ;;  %v518_v37 = vor.u32 %v669_v31, %v517_v30  ;;  %v605_v39 = vld [vmem:[#allocation2 + $0xc0] sm:$0xf] }
  0x23   :  { %384 = vmatpush.bf16.msrb.mxu1 %v594_v5  ;;  %v522_v38 = vor.u32 %v664_v33, %v519_v34  ;;  %v690_v40 = vld [vmem:[#allocation2 + $0xe4] sm:$0xf0]  ;;  %v685_v41 = vld [vmem:[#allocation2 + $0xc4] sm:$0xf]  ;;  %v607_v42 = vld [vmem:[#allocation2 + $0xe8] sm:$0xf0] }
  0x24   :  { %397 = vmatpush.bf16.msrb.mxu2 %v598_v11  ;;  %v606_v43 = vor.u32 %v690_v40, %v605_v39  ;;  %v610_v44 = vor.u32 %v685_v41, %v607_v42  ;;  %v565_v45 = vld [vmem:[#allocation2 + $0x70] sm:$0xf]  ;;  %v680_v46 = vld [vmem:[#allocation2 + $0x94] sm:$0xf0]  ;;  %v675_v47 = vld [vmem:[#allocation2 + $0x74] sm:$0xf] }
  0x25   :  { %410 = vmatpush.bf16.msrb.mxu3 %v602_v13  ;;  %v567_v48 = vld [vmem:[#allocation2 + $0x98] sm:$0xf0]  ;;  %v566_v49 = vor.u32 %v680_v46, %v565_v45  ;;  %v525_v51 = vld [vmem:[#allocation2 + $0x20] sm:$0xf]  ;;  %v670_v52 = vld [vmem:[#allocation2 + $0x44] sm:$0xf0] }
  0x26   :  { %372 = vmatpush.bf16.msrb.mxu0 %v550_v14  ;;  %v570_v50 = vor.u32 %v675_v47, %v567_v48  ;;  %v665_v53 = vld [vmem:[#allocation2 + $0x24] sm:$0xf]  ;;  %v527_v54 = vld [vmem:[#allocation2 + $0x48] sm:$0xf0]  ;;  %v526_v55 = vor.u32 %v670_v52, %v525_v51  ;;  %vm464_vm2 = vcmask 1042434   ;;  %vm466_vm3 = vcmask 1041408  }
  0x27   :  { %385 = vmatpush.bf16.msrb.mxu1 %v554_v18  ;;  %v530_v56 = vor.u32 %v665_v53, %v527_v54  ;;  %v86_v0 = vld [vmem:[#allocation4] sm:$0xff]  ;;  %vm468_vm4 = vcmask 1044484   ;;  %vm470_vm5 = vcmask 1046534   ;;  %vm472_vm6 = vcmask 1045508  }
  0x28   :  { %398 = vmatpush.bf16.msrb.mxu2 %v558_v25  ;;  %v292_v1 = vperm.slane %v86_v0, 2  ;;  %v293_v2 = vperm.slane %v86_v0, 3  ;;  %v291_v6 = vperm.slane %v86_v0, 1  ;;  %v294_v7 = vperm.slane %v86_v0, 4 }
  0x29   :  { %411 = vmatpush.bf16.msrb.mxu3 %v562_v28  ;;  %v295_v8 = vperm.slane %v86_v0, 5  ;;  %v296_v12 = vperm.slane %v86_v0, 6  ;;  %v297_v15 = vperm.slane %v86_v0, 7  ;;  %v290_v16 = vperm.slane %v86_v0, 0 }
  0x2a   :  { %373 = vmatpush.bf16.msrb.mxu0 %v510_v29  ;;  %vm474_vm7 = vcmask 1043456  }
  0x2b   :  { %386 = vmatpush.bf16.msrb.mxu1 %v514_v32  ;;  %v87_v32 = vld [vmem:[#allocation4 + $0x8] sm:$0x3] }
  0x2c   :  { %399 = vmatpush.bf16.msrb.mxu2 %v518_v37  ;;  %v298_v42 = vperm.slane %v87_v32, 0 }
  0x2d   :  { %412 = vmatpush.bf16.msrb.mxu3 %v522_v38  ;;  %655 = vmatmul.msk.bf16.vlgmr.msrb.gmra.mxu0 %vm310_vm0, %v790_v60  ;;  %v299_v38 = vperm.slane %v87_v32, 1 }
  0x2e   :  { %422 = vmatpush.bf16.msra.mxu0 %v646_v35  ;;  %656 = vmatmul.msk.bf16.vlgmr.msrb.gmra.mxu1 %vm310_vm0, %v790_v60 }
  0x2f   :  { %435 = vmatpush.bf16.msra.mxu1 %v650_v36  ;;  %657 = vmatmul.msk.bf16.vlgmr.msrb.gmra.mxu2 %vm310_vm0, %v790_v60 }
  0x30   :  { %658 = vmatmul.msk.bf16.vlgmr.msrb.gmra.mxu3 %vm310_vm0, %v790_v60 }
  0x32   :  { %423 = vmatpush.bf16.msra.mxu0 %v606_v43 }
  0x33   :  { %436 = vmatpush.bf16.msra.mxu1 %v610_v44  ;;  %v480_v44 = vlaneseq }
  0x35   :  { %vm482_vm8 = vcmp.lt.s32.totalorder %v480_v44, 256 }
  0x36   :  { %424 = vmatpush.bf16.msra.mxu0 %v566_v49 }
  0x37   :  { %437 = vmatpush.bf16.msra.mxu1 %v570_v50 }
  0x3a   :  { %425 = vmatpush.bf16.msra.mxu0 %v526_v55 }
  0x3b   :  { %438 = vmatpush.bf16.msra.mxu1 %v530_v56 }
  0x3d   :  { %659 = vmatmul.msk.bf16.vlgmr.msra.gmra.mxu0 %vm310_vm0, %v790_v60 }
  0x3e   :  { %660 = vmatmul.msk.bf16.vlgmr.msra.gmra.mxu1 %vm310_vm0, %v790_v60 }
  0x9a   :  { %v323_v57 = vpop.f32.mrf.mxu0 }
  0x9b   :  { %v336_v58 = vpop.f32.mrf.mxu1  ;;  %v324_v29 = vadd.f32 %v323_v57, %v290_v16 }
  0x9c   :  { %v337_v60 = vadd.f32 %v336_v58, %v291_v6 }
  0x9e   :  { %v454_v23 = vrot.slane %v337_v60, 7 }
  0xa0   :  { %v463_v33 = vsel %vm462_vm1, %v324_v29, %v454_v23 }
  0xa2   :  { %v349_v59 = vpop.f32.mrf.mxu2  ;;  %v325_v62 = vpop.f32.mrf.mxu0 }
  0xa3   :  { %v362_v61 = vpop.f32.mrf.mxu3  ;;  %v338_v63 = vpop.f32.mrf.mxu1  ;;  %v350_v10 = vadd.f32 %v349_v59, %v292_v1 }
  0xa4   :  { %v363_v11 = vadd.f32 %v362_v61, %v293_v2 }
  0xa5   :  { %v455_v17 = vrot.slane %v350_v10, 6 }
  0xa6   :  { %v456_v18 = vrot.slane %v363_v11, 5 }
  0xa8   :  { %v465_v30 = vsel %vm464_vm2, %v455_v17, %v456_v18 }
  0xa9   :  { %v467_v36 = vsel %vm466_vm3, %v463_v33, %v465_v30 }
  0xaa   :  { %v351_v3 = vpop.f32.mrf.mxu2  ;;  %v375_v5 = vpop.f32.mrf.mxu0 }
  0xab   :  { %v364_v4 = vpop.f32.mrf.mxu3  ;;  %v388_v9 = vpop.f32.mrf.mxu1  ;;  %v376_v13 = vadd.f32 %v375_v5, %v294_v7 }
  0xac   :  { %v389_v14 = vadd.f32 %v388_v9, %v295_v8 }
  0xad   :  { %v457_v24 = vrot.slane %v376_v13, 4 }
  0xae   :  { %v458_v25 = vrot.slane %v389_v14, 3 }
  0xb0   :  { %v469_v34 = vsel %vm468_vm4, %v457_v24, %v458_v25 }
  0xb2   :  { %v401_v19 = vpop.f32.mrf.mxu2  ;;  %v377_v22 = vpop.f32.mrf.mxu0 }
  0xb3   :  { %v402_v20 = vadd.f32 %v401_v19, %v296_v12  ;;  %v414_v21 = vpop.f32.mrf.mxu3  ;;  %v390_v27 = vpop.f32.mrf.mxu1 }
  0xb4   :  { %v415_v26 = vadd.f32 %v414_v21, %v297_v15 }
  0xb5   :  { %v459_v28 = vrot.slane %v402_v20, 2 }
  0xb6   :  { %v460_v31 = vrot.slane %v415_v26, 1 }
  0xb8   :  { %v471_v35 = vsel %vm470_vm5, %v459_v28, %v460_v31 }
  0xb9   :  { %v473_v37 = vsel %vm472_vm6, %v469_v34, %v471_v35 }
  0xba   :  { %v475_v39 = vsel %vm474_vm7, %v467_v36, %v473_v37  ;;  %v403_v40 = vpop.f32.mrf.mxu2  ;;  %v427_v43 = vpop.f32.mrf.mxu0 }
  0xbb   :  { %479 = vst [vmem:[%s823_s3] sm:$0xff] %v475_v39  ;;  %v416_v41 = vpop.f32.mrf.mxu3  ;;  %v440_v45 = vpop.f32.mrf.mxu1  ;;  %v428_v47 = vadd.f32 %v427_v43, %v298_v42 }
  0xbc   :  { %v441_v46 = vadd.f32 %v440_v45, %v299_v38 }
  0xbe   :  { %v461_v48 = vrot.slane %v441_v46, 7 }
  0xc0   :  { %v476_v49 = vsel %vm462_vm1, %v428_v47, %v461_v48 }
  0xc1   :  { %484 = vst.msk [vmem:[%s823_s3 + $0x8] sm:$0x3] %vm482_vm8, %v476_v49 }
  0xc2   :  { %v429_v50 = vpop.f32.mrf.mxu0 }
  0xc3   :  { %v442_v51 = vpop.f32.mrf.mxu1 }
  0xc4   :  { %489 = vsyncpa [#allocation3], 1 }
  0xc5   :  { %490 = vsyncpa [#allocation5], 1 }

</bundles_post_ra>
